<compile_context>
chip_gen: v5e
topology: v5e:2x2
jax: 0.10.0
libtpu: 0.0.40
codegen_flags: <defaults>
</compile_context>

<pallas_src>
import functools

import jax
import jax.numpy as jnp
from jax.experimental import pallas as pl
from jax.experimental.pallas import tpu as pltpu


# ----------------------------- config (synthetic) -----------------------------
VOCAB_SIZE = 128
EMBEDDING_DIM = 32
MAX_POSITION_EMBEDDINGS = 64
TYPE_VOCAB_SIZE = 2
PAD_TOKEN_ID = 0
LAYER_NORM_EPS = 1e-12


# --------------------------------- kernel -------------------------------------
def _embeddings_kernel(ids_ref, tt_ref, wte_ref, tte_ref, pos_ref,
                       gamma_ref, beta_ref, out_ref, *, eps):
    # Per-grid-step shapes (rows = row_tile flattened B*S rows):
    #   ids_ref : [rows, 1] int32   flattened word ids
    #   tt_ref  : [rows, 1] int32   flattened token-type ids
    #   wte_ref : [V, D]    f32     word embedding table (resident)
    #   tte_ref : [T, D]    f32     token-type embedding table (resident)
    #   pos_ref : [rows, D] f32     per-row position embeddings
    #   gamma_ref, beta_ref : [1, D] f32
    #   out_ref : [rows, D] f32
    rows = ids_ref.shape[0]
    V, D = wte_ref.shape
    T = tte_ref.shape[0]

    ids = ids_ref[...]  # [rows, 1]
    tt = tt_ref[...]    # [rows, 1]

    # Word-embedding gather as a one-hot matmul (MXU).  Exact: each output
    # element is a single-term sum.  Fine at V=128; see TODO above for real V.
    iota_v = jax.lax.broadcasted_iota(jnp.int32, (rows, V), 1)
    onehot_w = (iota_v == ids).astype(jnp.float32)                     # [rows, V]
    word_emb = jnp.dot(onehot_w, wte_ref[...],
                       preferred_element_type=jnp.float32)             # [rows, D]

    # Token-type embedding via VPU select over the (tiny, static) type table.
    # Unrolled over T (T == 2 for this config) -> 1 compare + 1 select per type.
    tok_type_emb = tte_ref[0:1, :]                                     # [1, D]
    for t in range(1, T):
        tok_type_emb = jnp.where(tt == t, tte_ref[t:t + 1, :], tok_type_emb)
    # tok_type_emb broadcasts to [rows, D] in the add below.

    # embeddings = inputs_embeds + token_type_embeddings + position_embeddings
    emb = word_emb + tok_type_emb + pos_ref[...]                       # [rows, D]

    # LayerNorm over the hidden dim, all-f32, rsqrt on the EUP slot.
    mean = jnp.mean(emb, axis=-1, keepdims=True)
    centered = emb - mean
    var = jnp.mean(centered * centered, axis=-1, keepdims=True)
    normed = centered * jax.lax.rsqrt(var + eps)
    y = normed * gamma_ref[...] + beta_ref[...]

    # Dropout: identity (eval mode).
    out_ref[...] = y.astype(out_ref.dtype)


# --------------------------------- wrapper ------------------------------------
def bilstm_embeddings(input_ids, token_type_ids, word_emb, pos_emb, tt_emb,
                      ln_gamma, ln_beta, *, eps=LAYER_NORM_EPS,
                      past_key_values_length=0, row_tile=None):
    """Pallas implementation of BiLSTMEmbeddings.forward (eval mode)."""
    B, S = input_ids.shape
    V, D = word_emb.shape
    T = tt_emb.shape[0]
    N = B * S

    # One big row tile while N is small; tile at 256 rows beyond that so the
    # MXU sees full systolic-height passes and tiles shard across TCs.
    if row_tile is None:
        row_tile = N if N <= 256 else 256
    num_tiles = pl.cdiv(N, row_tile)
    N_pad = num_tiles * row_tile

    # position_ids default: arange(past_kv_len, S + past_kv_len) -> static slice,
    # then replicated per batch row so the kernel sees a flat [N, D] slab.
    pos_slice = jax.lax.dynamic_slice(
        pos_emb, (past_key_values_length, 0), (S, D))                  # [S, D]
    pos_flat = jnp.tile(pos_slice, (B, 1))                             # [N, D]

    ids_flat = input_ids.astype(jnp.int32).reshape(N, 1)
    tt_flat = token_type_ids.astype(jnp.int32).reshape(N, 1)

    if N_pad != N:
        pad = N_pad - N
        ids_flat = jnp.pad(ids_flat, ((0, pad), (0, 0)))   # pad rows -> token 0
        tt_flat = jnp.pad(tt_flat, ((0, pad), (0, 0)))
        pos_flat = jnp.pad(pos_flat, ((0, pad), (0, 0)))

    gamma2 = ln_gamma.reshape(1, D)
    beta2 = ln_beta.reshape(1, D)

    kernel = functools.partial(_embeddings_kernel, eps=eps)

    out_flat = pl.pallas_call(
        kernel,
        out_shape=jax.ShapeDtypeStruct((N_pad, D), jnp.float32),
        grid_spec=pltpu.PrefetchScalarGridSpec(
            num_scalar_prefetch=0,
            grid=(num_tiles,),
            in_specs=[
                pl.BlockSpec((row_tile, 1), lambda i: (i, 0)),   # word ids
                pl.BlockSpec((row_tile, 1), lambda i: (i, 0)),   # token-type ids
                pl.BlockSpec((V, D), lambda i: (0, 0)),          # word table
                pl.BlockSpec((T, D), lambda i: (0, 0)),          # token-type table
                pl.BlockSpec((row_tile, D), lambda i: (i, 0)),   # positions
                pl.BlockSpec((1, D), lambda i: (0, 0)),          # LN gamma
                pl.BlockSpec((1, D), lambda i: (0, 0)),          # LN beta
            ],
            out_specs=pl.BlockSpec((row_tile, D), lambda i: (i, 0)),
        ),
        compiler_params=pltpu.CompilerParams(
            dimension_semantics=("parallel",)),
    )(ids_flat, tt_flat, word_emb, tt_emb, pos_flat, gamma2, beta2)

    if N_pad != N:
        out_flat = out_flat[:N]
    return out_flat.reshape(B, S, D)


# -------------------------- pure-JAX reference (check) -------------------------
def _reference(input_ids, token_type_ids, word_emb, pos_emb, tt_emb,
               ln_gamma, ln_beta, eps=LAYER_NORM_EPS):
    B, S = input_ids.shape
    we = word_emb[input_ids]                       # [B, S, D]
    te = tt_emb[token_type_ids]                    # [B, S, D]
    pe = pos_emb[jnp.arange(S)][None]              # [1, S, D]
    emb = we + te + pe
    mean = jnp.mean(emb, axis=-1, keepdims=True)
    var = jnp.mean((emb - mean) ** 2, axis=-1, keepdims=True)
    normed = (emb - mean) / jnp.sqrt(var + eps)
    return normed * ln_gamma + ln_beta


# ----------------------------------- main --------------------------------------
if __name__ == "__main__":
    key = jax.random.PRNGKey(0)
    k_ids, k_tt, k_wte, k_pos, k_tte, k_gamma, k_beta = jax.random.split(key, 7)

    B, S = 2, 8
    V, D = VOCAB_SIZE, EMBEDDING_DIM

    # Deterministic synthetic parameters (shapes from __init__).
    word_emb = jax.random.normal(k_wte, (V, D), dtype=jnp.float32) * 0.02
    word_emb = word_emb.at[PAD_TOKEN_ID].set(0.0)  # padding_idx row zeroed
    pos_emb = jax.random.normal(k_pos, (MAX_POSITION_EMBEDDINGS, D),
                                dtype=jnp.float32) * 0.02
    tt_emb = jax.random.normal(k_tte, (TYPE_VOCAB_SIZE, D),
                               dtype=jnp.float32) * 0.02
    ln_gamma = jnp.ones((D,), dtype=jnp.float32) + \
        0.01 * jax.random.normal(k_gamma, (D,), dtype=jnp.float32)
    ln_beta = 0.01 * jax.random.normal(k_beta, (D,), dtype=jnp.float32)

    # Deterministic synthetic inputs (explicit token_type_ids exercises the
    # VPU-select path; zeros would match the module's default buffer path).
    input_ids = jax.random.randint(k_ids, (B, S), 0, V, dtype=jnp.int32)
    token_type_ids = jax.random.randint(k_tt, (B, S), 0, TYPE_VOCAB_SIZE,
                                        dtype=jnp.int32)

    out = bilstm_embeddings(input_ids, token_type_ids, word_emb, pos_emb,
                            tt_emb, ln_gamma, ln_beta)
    out = jax.block_until_ready(out)

    ref = _reference(input_ids, token_type_ids, word_emb, pos_emb,
                     tt_emb, ln_gamma, ln_beta)
    assert out.shape == (B, S, D)
    assert jnp.allclose(out, ref, atol=1e-5, rtol=1e-5), "mismatch vs reference"

    print("KERNEL_OK")
</pallas_src>

<mosaic_0001>
module attributes {stable_mosaic.version = 11 : i64} {
  func.func @_embeddings_kernel(%arg0: i32, %arg1: memref<16x1xi32, #tpu.memory_space<vmem>>, %arg2: memref<16x1xi32, #tpu.memory_space<vmem>>, %arg3: memref<128x32xf32, #tpu.memory_space<vmem>>, %arg4: memref<2x32xf32, #tpu.memory_space<vmem>>, %arg5: memref<16x32xf32, #tpu.memory_space<vmem>>, %arg6: memref<1x32xf32, #tpu.memory_space<vmem>>, %arg7: memref<1x32xf32, #tpu.memory_space<vmem>>, %arg8: memref<16x32xf32, #tpu.memory_space<vmem>>) attributes {dimension_semantics = [#tpu.dimension_semantics<parallel>], iteration_bounds = array<i64: 1>, scalar_prefetch = 0 : i64, scratch_operands = 0 : i64, tpu.core_type = #tpu.core_type<tc>, window_params = [{transform_indices = @transform_0, window_bounds = array<i64: 16, 1>}, {transform_indices = @transform_1, window_bounds = array<i64: 16, 1>}, {pipeline_mode = #tpu.pipeline_mode<synchronous>, transform_indices = @transform_2, window_bounds = array<i64: 128, 32>}, {pipeline_mode = #tpu.pipeline_mode<synchronous>, transform_indices = @transform_3, window_bounds = array<i64: 2, 32>}, {transform_indices = @transform_4, window_bounds = array<i64: 16, 32>}, {pipeline_mode = #tpu.pipeline_mode<synchronous>, transform_indices = @transform_5, window_bounds = array<i64: 1, 32>}, {pipeline_mode = #tpu.pipeline_mode<synchronous>, transform_indices = @transform_6, window_bounds = array<i64: 1, 32>}, {transform_indices = @transform_7, window_bounds = array<i64: 16, 32>}]} {
    %c0 = arith.constant 0 : index
    %c0_0 = arith.constant 0 : index
    %0 = vector.load %arg1[%c0, %c0_0] : memref<16x1xi32, #tpu.memory_space<vmem>>, vector<16x1xi32>
    %c0_1 = arith.constant 0 : index
    %c0_2 = arith.constant 0 : index
    %1 = vector.load %arg2[%c0_1, %c0_2] : memref<16x1xi32, #tpu.memory_space<vmem>>, vector<16x1xi32>
    %2 = tpu.iota {dimensions = array<i32: 1>} : vector<16x128xi32>
    %3 = vector.broadcast %0 : vector<16x1xi32> to vector<16x128xi32>
    %4 = arith.cmpi eq, %2, %3 : vector<16x128xi32>
    %5 = arith.extui %4 : vector<16x128xi1> to vector<16x128xi32>
    %6 = arith.sitofp %5 : vector<16x128xi32> to vector<16x128xf32>
    %c0_3 = arith.constant 0 : index
    %c0_4 = arith.constant 0 : index
    %7 = vector.load %arg3[%c0_3, %c0_4] : memref<128x32xf32, #tpu.memory_space<vmem>>, vector<128x32xf32>
    %cst = arith.constant dense<0.000000e+00> : vector<16x32xf32>
    %8 = tpu.matmul %6, %7, %cst {dimension_numbers = #tpu.dot_dimension_numbers<[1], [0], [0], [1], [0, 0, 1, 1], [], []>} : vector<16x128xf32>, vector<128x32xf32>, vector<16x32xf32> -> vector<16x32xf32>
    %c0_5 = arith.constant 0 : index
    %c0_6 = arith.constant 0 : index
    %9 = vector.load %arg4[%c0_5, %c0_6] : memref<2x32xf32, #tpu.memory_space<vmem>>, vector<1x32xf32>
    %c1_i32 = arith.constant 1 : i32
    %10 = vector.broadcast %c1_i32 : i32 to vector<16x1xi32>
    %11 = arith.cmpi eq, %1, %10 : vector<16x1xi32>
    %c1 = arith.constant 1 : index
    %c0_7 = arith.constant 0 : index
    %12 = vector.load %arg4[%c1, %c0_7] : memref<2x32xf32, #tpu.memory_space<vmem>>, vector<1x32xf32>
    %13 = vector.shape_cast %11 : vector<16x1xi1> to vector<16x1xi1>
    %14 = vector.broadcast %13 : vector<16x1xi1> to vector<16x32xi1>
    %15 = vector.shape_cast %12 : vector<1x32xf32> to vector<1x32xf32>
    %16 = vector.broadcast %15 : vector<1x32xf32> to vector<16x32xf32>
    %17 = vector.shape_cast %9 : vector<1x32xf32> to vector<1x32xf32>
    %18 = vector.broadcast %17 : vector<1x32xf32> to vector<16x32xf32>
    %19 = arith.select %14, %16, %18 : vector<16x32xi1>, vector<16x32xf32>
    %20 = arith.addf %8, %19 : vector<16x32xf32>
    %c0_8 = arith.constant 0 : index
    %c0_9 = arith.constant 0 : index
    %21 = vector.load %arg5[%c0_8, %c0_9] : memref<16x32xf32, #tpu.memory_space<vmem>>, vector<16x32xf32>
    %22 = arith.addf %20, %21 : vector<16x32xf32>
    %cst_10 = arith.constant dense<0.000000e+00> : vector<16xf32>
    %23 = vector.multi_reduction <add>, %22, %cst_10 [1] : vector<16x32xf32> to vector<16xf32>
    %24 = vector.shape_cast %23 : vector<16xf32> to vector<16x1xf32>
    %cst_11 = arith.constant 3.200000e+01 : f32
    %25 = vector.broadcast %cst_11 : f32 to vector<16x1xf32>
    %26 = arith.divf %24, %25 : vector<16x1xf32>
    %27 = vector.broadcast %26 : vector<16x1xf32> to vector<16x32xf32>
    %28 = arith.subf %22, %27 : vector<16x32xf32>
    %29 = arith.mulf %28, %28 : vector<16x32xf32>
    %cst_12 = arith.constant dense<0.000000e+00> : vector<16xf32>
    %30 = vector.multi_reduction <add>, %29, %cst_12 [1] : vector<16x32xf32> to vector<16xf32>
    %31 = vector.shape_cast %30 : vector<16xf32> to vector<16x1xf32>
    %cst_13 = arith.constant 3.200000e+01 : f32
    %32 = vector.broadcast %cst_13 : f32 to vector<16x1xf32>
    %33 = arith.divf %31, %32 : vector<16x1xf32>
    %cst_14 = arith.constant 9.99999996E-13 : f32
    %34 = vector.broadcast %cst_14 : f32 to vector<16x1xf32>
    %35 = arith.addf %33, %34 : vector<16x1xf32>
    %36 = math.rsqrt %35 : vector<16x1xf32>
    %37 = vector.broadcast %36 : vector<16x1xf32> to vector<16x32xf32>
    %38 = arith.mulf %28, %37 : vector<16x32xf32>
    %c0_15 = arith.constant 0 : index
    %c0_16 = arith.constant 0 : index
    %39 = vector.load %arg6[%c0_15, %c0_16] : memref<1x32xf32, #tpu.memory_space<vmem>>, vector<1x32xf32>
    %40 = vector.broadcast %39 : vector<1x32xf32> to vector<16x32xf32>
    %41 = arith.mulf %38, %40 : vector<16x32xf32>
    %c0_17 = arith.constant 0 : index
    %c0_18 = arith.constant 0 : index
    %42 = vector.load %arg7[%c0_17, %c0_18] : memref<1x32xf32, #tpu.memory_space<vmem>>, vector<1x32xf32>
    %43 = vector.broadcast %42 : vector<1x32xf32> to vector<16x32xf32>
    %44 = arith.addf %41, %43 : vector<16x32xf32>
    %c0_19 = arith.constant 0 : index
    %c0_20 = arith.constant 0 : index
    %45 = vector.load %arg8[%c0_19, %c0_20] : memref<16x32xf32, #tpu.memory_space<vmem>>, vector<16x32xf32>
    tpu.vector_store %arg8[%c0_19, %c0_20], %44 {strides = array<i32>} : memref<16x32xf32, #tpu.memory_space<vmem>>, vector<16x32xf32>,
    return
  }
  func.func @transform_0(%arg0: i32) -> (i32, i32) {
    %c0_i32 = arith.constant 0 : i32
    %c0_i32_0 = arith.constant 0 : i32
    return %arg0, %c0_i32 : i32, i32
  }
  func.func @transform_1(%arg0: i32) -> (i32, i32) {
    %c0_i32 = arith.constant 0 : i32
    %c0_i32_0 = arith.constant 0 : i32
    return %arg0, %c0_i32 : i32, i32
  }
  func.func @transform_2(%arg0: i32) -> (i32, i32) {
    %c0_i32 = arith.constant 0 : i32
    %c0_i32_0 = arith.constant 0 : i32
    %c0_i32_1 = arith.constant 0 : i32
    return %c0_i32, %c0_i32_0 : i32, i32
  }
  func.func @transform_3(%arg0: i32) -> (i32, i32) {
    %c0_i32 = arith.constant 0 : i32
    %c0_i32_0 = arith.constant 0 : i32
    %c0_i32_1 = arith.constant 0 : i32
    return %c0_i32, %c0_i32_0 : i32, i32
  }
  func.func @transform_4(%arg0: i32) -> (i32, i32) {
    %c0_i32 = arith.constant 0 : i32
    %c0_i32_0 = arith.constant 0 : i32
    return %arg0, %c0_i32 : i32, i32
  }
  func.func @transform_5(%arg0: i32) -> (i32, i32) {
    %c0_i32 = arith.constant 0 : i32
    %c0_i32_0 = arith.constant 0 : i32
    %c0_i32_1 = arith.constant 0 : i32
    return %c0_i32, %c0_i32_0 : i32, i32
  }
  func.func @transform_6(%arg0: i32) -> (i32, i32) {
    %c0_i32 = arith.constant 0 : i32
    %c0_i32_0 = arith.constant 0 : i32
    %c0_i32_1 = arith.constant 0 : i32
    return %c0_i32, %c0_i32_0 : i32, i32
  }
  func.func @transform_7(%arg0: i32) -> (i32, i32) {
    %c0_i32 = arith.constant 0 : i32
    %c0_i32_0 = arith.constant 0 : i32
    return %arg0, %c0_i32 : i32, i32
  }
}

</mosaic_0001>

<bundles_post_ra>
// kernel: tpu_custom_call.1
= control target key start
LH: loop header
LB: loop body
LE: loop exit
PB: predicated region body
PF: predicated region fallthrough
CT: control target
= control target key end

     0   :  { %v254_v2 = vmov 0   ;;  %s387_s0 = inlined_call_operand.vmem [shape: s32[16,1], index: 0, kind: input, shape index: {}]   ;;  %s388_s1 = inlined_call_operand.vmem [shape: s32[16,1], index: 1, kind: input, shape index: {}]   ;;  %s389_s2 = inlined_call_operand.vmem [shape: f32[128,32], index: 2, kind: input, shape index: {}]   ;;  %s390_s3 = inlined_call_operand.vmem [shape: f32[2,32], index: 3, kind: input, shape index: {}]   ;;  %s391_s4 = inlined_call_operand.vmem [shape: f32[16,32], index: 4, kind: input, shape index: {}]   ;;  %s392_s5 = inlined_call_operand.vmem [shape: f32[1,32], index: 5, kind: input, shape index: {}]   ;;  %s393_s6 = inlined_call_operand.vmem [shape: f32[1,32], index: 6, kind: input, shape index: {}]   ;;  %s394_s7 = inlined_call_operand.hbm [shape: f32[16,32], index: 7, kind: output, shape index: {}]  }
   0x1   :  { %v27_v0 = vld [vmem:[%s387_s0] sm:$0xff]  ;;  %v60_v1 = vld [vmem:[%s389_s2 + $0x78] sm:$0xff]  ;;  %216 = vset.pattern.permute.xlu0 %v254_v2  ;;  %v59_v3 = vld [vmem:[%s389_s2 + $0x70] sm:$0xff]  ;;  %217 = vset.pattern.permute.xlu1 %v254_v2 }
   0x2   :  { %79 = vmatpush.msra.mxu0 %v60_v1  ;;  %34 = vperm.xlu0 %216, %v27_v0   ;;  %v58_v4 = vld [vmem:[%s389_s2 + $0x68] sm:$0xff]  ;;  %v57_v5 = vld [vmem:[%s389_s2 + $0x60] sm:$0xff]  ;;  %v56_v6 = vld [vmem:[%s389_s2 + $0x58] sm:$0xff] }
   0x3   :  { %194 = vmatpush.msra.mxu1 %v60_v1 }
   0x4   :  { %80 = vmatpush.msra.mxu0 %v59_v3 }
   0x5   :  { %195 = vmatpush.msra.mxu1 %v59_v3 }
   0x6   :  { %81 = vmatpush.msra.mxu0 %v58_v4 }
   0x7   :  { %196 = vmatpush.msra.mxu1 %v58_v4 }
   0x8   :  { %12 = vsyncpa [#allocation3], 0  ;;  %v28_v7 = vld [vmem:[%s387_s0 + $0x8] sm:$0xff]  ;;  %82 = vmatpush.msra.mxu0 %v57_v5  ;;  %v55_v8 = vld [vmem:[%s389_s2 + $0x50] sm:$0xff]  ;;  %v31_v23 = vlaneseq  ;;  %v255_v26 = vmov 1.0   ;;  %vm106_vm5 = vcmask 261120  }
   0x9   :  { %197 = vmatpush.msra.mxu1 %v57_v5  ;;  %v54_v9 = vld [vmem:[%s389_s2 + $0x48] sm:$0xff]  ;;  %v53_v10 = vld [vmem:[%s389_s2 + $0x40] sm:$0xff]  ;;  %v52_v11 = vld [vmem:[%s389_s2 + $0x38] sm:$0xff]  ;;  %v256_v44 = vmov 32.0   ;;  %s178_s27 = sshll.u32 %s394_s7, 4  ;;  %s259_s28 = smov 8   ;;  %s179_s27 = int_to_ptr.hbm [resolvable:$true] %s178_s27 }
   0xa   :  { %83 = vmatpush.msra.mxu0 %v56_v6  ;;  %37 = vperm.xlu0 %216, %v28_v7   ;;  %v51_v12 = vld [vmem:[%s389_s2 + $0x30] sm:$0xff]  ;;  %v50_v13 = vld [vmem:[%s389_s2 + $0x28] sm:$0xff]  ;;  %v49_v14 = vld [vmem:[%s389_s2 + $0x20] sm:$0xff]  ;;  %v32_v24 = vand.u32 127, %v31_v23  ;;  %222 = vrcp.f32 %v256_v44 }
   0xb   :  { %198 = vmatpush.msra.mxu1 %v56_v6  ;;  %v48_v15 = vld [vmem:[%s389_s2 + $0x18] sm:$0xff]  ;;  %v47_v16 = vld [vmem:[%s389_s2 + $0x10] sm:$0xff]  ;;  %v46_v17 = vld [vmem:[%s389_s2 + $0x8] sm:$0xff] }
   0xc   :  { %84 = vmatpush.msra.mxu0 %v55_v8  ;;  %v45_v18 = vld [vmem:[%s389_s2] sm:$0xff]  ;;  %v30_v21 = vld [vmem:[%s388_s1 + $0x8] sm:$0xff] }
   0xd   :  { %199 = vmatpush.msra.mxu1 %v55_v8  ;;  %v29_v19 = vld [vmem:[%s388_s1] sm:$0xff]  ;;  %vm63_vm1 = vcmp.eq.s32.totalorder %v30_v21, 1  ;;  %v103_v40 = vld [vmem:[%s391_s4 + $0x8] sm:$0xff] }
   0xe   :  { %85 = vmatpush.msra.mxu0 %v54_v9  ;;  %vm62_vm0 = vcmp.eq.s32.totalorder %v29_v19, 1  ;;  %v66_v22 = vsel %vm63_vm1, 1, %v254_v2  ;;  %v218_v29 = vld [vmem:[%s390_s3 + $0x1] ss:$0 sm:$0xff]  ;;  %v219_v30 = vld [vmem:[%s390_s3] ss:$0 sm:$0xff] }
   0xf   :  { %200 = vmatpush.msra.mxu1 %v54_v9  ;;  %v65_v20 = vsel %vm62_vm0, 1, %v254_v2  ;;  %v102_v33 = vld [vmem:[%s391_s4] sm:$0xff] }
  0x10   :  { %86 = vmatpush.msra.mxu0 %v53_v10  ;;  %68 = vperm.xlu1 %217, %v65_v20   ;;  %v223_v45 = vpop.eup %222 }
  0x11   :  { %201 = vmatpush.msra.mxu1 %v53_v10  ;;  %v114_v46 = vmul.f32 32.0, %v223_v45  ;;  %vm118_vm7 = vweird.f32 %v223_v45 }
  0x12   :  { %87 = vmatpush.msra.mxu0 %v52_v11 }
  0x13   :  { %202 = vmatpush.msra.mxu1 %v52_v11  ;;  %v115_v47 = vsub.f32 1.0, %v114_v46  ;;  %v220_v11 = vld [vmem:[%s392_s5] ss:$0 sm:$0xff]  ;;  %s257_s5 = smov [#allocation2]  }
  0x14   :  { %88 = vmatpush.msra.mxu0 %v51_v12  ;;  %s176_s24 = sshll.u32 %s257_s5, 4  ;;  %s177_s24 = int_to_ptr.vmem [resolvable:$true] %s176_s24 }
  0x15   :  { %203 = vmatpush.msra.mxu1 %v51_v12  ;;  %v116_v48 = vmul.f32 %v223_v45, %v115_v47 }
  0x16   :  { %89 = vmatpush.msra.mxu0 %v50_v13 }
  0x17   :  { %204 = vmatpush.msra.mxu1 %v50_v13  ;;  %v117_v49 = vadd.f32 %v223_v45, %v116_v48 }
  0x18   :  { %90 = vmatpush.msra.mxu0 %v49_v14  ;;  %71 = vperm.xlu1 %217, %v66_v22  }
  0x19   :  { %205 = vmatpush.msra.mxu1 %v49_v14  ;;  %v119_v50 = vsel %vm118_vm7, %v223_v45, %v117_v49 }
  0x1a   :  { %91 = vmatpush.msra.mxu0 %v48_v15 }
  0x1b   :  { %206 = vmatpush.msra.mxu1 %v48_v15  ;;  %v221_v15 = vld [vmem:[%s393_s6] ss:$0 sm:$0xff]  ;;  %s258_s6 = smov 128  }
  0x1c   :  { %92 = vmatpush.msra.mxu0 %v47_v16 }
  0x1d   :  { %207 = vmatpush.msra.mxu1 %v47_v16 }
  0x1e   :  { %93 = vmatpush.msra.mxu0 %v46_v17 }
  0x1f   :  { %208 = vmatpush.msra.mxu1 %v46_v17 }
  0x20   :  { %94 = vmatpush.msra.mxu0 %v45_v18 }
  0x21   :  { %209 = vmatpush.msra.mxu1 %v45_v18 }
  0x74   :  { %v35_v25 = vpop.permute.xlu0 %34 }
  0x75   :  { %vm39_vm2 = vcmp.eq.s32.totalorder %v32_v24, %v35_v25 }
  0x76   :  { %192 = vmatmul.msk.f32.vlgmr.msra.gmra.mxu0 %vm39_vm2, %v255_v26 }
  0x7c   :  { %v38_v27 = vpop.permute.xlu0 %37 }
  0x7d   :  { %vm40_vm3 = vcmp.eq.s32.totalorder %v32_v24, %v38_v27 }
  0x7e   :  { %193 = vmatmul.msk.f32.vlgmr.msra.gmra.mxu1 %vm40_vm3, %v255_v26 }
  0x82   :  { %v69_v28 = vpop.permute.xlu1 %68 }
  0x83   :  { %vm73_vm4 = vcmp.eq.s32.totalorder %v69_v28, 1 }
  0x84   :  { %v77_v31 = vsel %vm73_vm4, %v218_v29, %v219_v30 }
  0x8a   :  { %v72_v35 = vpop.permute.xlu1 %71 }
  0x8b   :  { %vm74_vm6 = vcmp.eq.s32.totalorder %v72_v35, 1 }
  0x8c   :  { %v78_v38 = vsel %vm74_vm6, %v218_v29, %v219_v30 }
  0xf3   :  { %v96_v32 = vpop.f32.mrf.mxu0 }
  0xf4   :  { %v97_v34 = vadd.f32 %v96_v32, %v77_v31 }
  0xf6   :  { %v104_v36 = vadd.f32 %v102_v33, %v97_v34 }
  0xf8   :  { %v107_v37 = vsel %vm106_vm5, %v104_v36, 0.0 }
  0xf9   :  { %108 = vadd.xlane.f32.xlu2 %v107_v37 }
  0xfb   :  { %v99_v39 = vpop.f32.mrf.mxu1 }
  0xfc   :  { %v100_v41 = vadd.f32 %v99_v39, %v78_v38 }
  0xfe   :  { %v105_v42 = vadd.f32 %v103_v40, %v100_v41 }
 0x100   :  { %v110_v43 = vsel %vm106_vm5, %v105_v42, 0.0 }
 0x101   :  { %111 = vadd.xlane.f32.xlu2 %v110_v43 }
 0x16c   :  { %v109_v51 = vpop.xlane.xlu2 %108 }
 0x16d   :  { %v120_v52 = vmul.f32 %v119_v50, %v109_v51 }
 0x16f   :  { %v122_v53 = vsub.f32 %v104_v36, %v120_v52 }
 0x171   :  { %v124_v54 = vmul.f32 %v122_v53, %v122_v53 }
 0x173   :  { %v126_v55 = vsel %vm106_vm5, %v124_v54, 0.0 }
 0x174   :  { %127 = vadd.xlane.f32.xlu0 %v126_v55  ;;  %v112_v56 = vpop.xlane.xlu2 %111 }
 0x175   :  { %v121_v57 = vmul.f32 %v119_v50, %v112_v56 }
 0x177   :  { %v123_v58 = vsub.f32 %v105_v42, %v121_v57 }
 0x179   :  { %v125_v59 = vmul.f32 %v123_v58, %v123_v58 }
 0x17b   :  { %v129_v60 = vsel %vm106_vm5, %v125_v59, 0.0 }
 0x17c   :  { %130 = vadd.xlane.f32.xlu1 %v129_v60 }
 0x1e7   :  { %v128_v61 = vpop.xlane.xlu0 %127 }
 0x1e8   :  { %v132_v62 = vmul.f32 %v128_v61, %v119_v50 }
 0x1ea   :  { %v134_v63 = vadd.f32 1e-12, %v132_v62 }
 0x1ec   :  { %224 = vrsqrt.f32 %v134_v63  ;;  %vm142_vm9 = vweird.f32 %v134_v63 }
 0x1ef   :  { %v131_v0 = vpop.xlane.xlu1 %130 }
 0x1f0   :  { %v133_v1 = vmul.f32 %v131_v0, %v119_v50 }
 0x1f2   :  { %v225_v2 = vpop.eup %224  ;;  %v135_v3 = vadd.f32 1e-12, %v133_v1 }
 0x1f3   :  { %v137_v4 = vmul.f32 %v225_v2, %v134_v63  ;;  %vm143_vm8 = vweird.f32 %v225_v2 }
 0x1f4   :  { %226 = vrsqrt.f32 %v135_v3  ;;  %vm144_vm10 = vmor %vm142_vm9, %vm143_vm8  ;;  %vm152_vm12 = vweird.f32 %v135_v3 }
 0x1f5   :  { %v138_v5 = vmul.f32 %v225_v2, %v137_v4 }
 0x1f7   :  { %v139_v6 = vmul.f32 0.5, %v138_v5 }
 0x1f9   :  { %v140_v7 = vsub.f32 1.5, %v139_v6 }
 0x1fa   :  { %v227_v8 = vpop.eup %226 }
 0x1fb   :  { %v141_v9 = vmul.f32 %v225_v2, %v140_v7  ;;  %v147_v10 = vmul.f32 %v227_v8, %v135_v3  ;;  %vm153_vm11 = vweird.f32 %v227_v8 }
 0x1fc   :  { %vm154_vm13 = vmor %vm152_vm12, %vm153_vm11 }
 0x1fd   :  { %v145_v12 = vsel %vm144_vm10, %v225_v2, %v141_v9  ;;  %v148_v13 = vmul.f32 %v227_v8, %v147_v10 }
 0x1fe   :  { %v156_v14 = vmul.f32 %v145_v12, %v122_v53 }
 0x1ff   :  { %v149_v16 = vmul.f32 0.5, %v148_v13 }
 0x200   :  { %v162_v17 = vmul.f32 %v220_v11, %v156_v14 }
 0x201   :  { %v150_v18 = vsub.f32 1.5, %v149_v16 }
 0x202   :  { %v168_v19 = vadd.f32 %v221_v15, %v162_v17 }
 0x203   :  { %v151_v20 = vmul.f32 %v227_v8, %v150_v18 }
 0x204   :  { %170 = vst.msk [vmem:[#allocation2] sm:$0xff] %vm106_vm5, %v168_v19 }
 0x205   :  { %v155_v21 = vsel %vm154_vm13, %v227_v8, %v151_v20 }
 0x206   :  { %v157_v22 = vmul.f32 %v155_v21, %v123_v58 }
 0x208   :  { %v163_v23 = vmul.f32 %v220_v11, %v157_v22 }
 0x20a   :  { %v169_v24 = vadd.f32 %v221_v15, %v163_v23 }
 0x20c   :  { %171 = vst.msk [vmem:[#allocation2 + $0x8] sm:$0xff] %vm106_vm5, %v169_v24 }
 0x20d   :  { %184 = dma.vmem_to_hbm [thread:$0]  %s177_s24, 256, %s179_s27, [#allocation3], %s258_s6, %s258_s6, %s259_s28  }
 0x20e   :  { %252 = dma.done.wait [#allocation3], 256  }
 0x20f   :  { %253 = vsyncadd [#allocation3], 4294967040 }
 0x210   :  { %189 = vsyncpa [#allocation3], 1 }

</bundles_post_ra>
